<compile_context>
chip_gen: v6e
topology: v6e:2x2x1
jax: 0.10.0
libtpu: 0.0.40
codegen_flags: <defaults>
</compile_context>

<pallas_src>
import functools

import jax
import jax.numpy as jnp
from jax.experimental import pallas as pl
from jax.experimental.pallas import tpu as pltpu

NUM_NEURONS = 16
NUM_LAYERS = 9            # Linear(2,16,bias) + 8 hidden Linear(16,16,no bias)
NUM_HIDDEN = NUM_LAYERS - 1
IN_DIM = 2
OUT_DIM = 3
LANE = 128


def _round_up(x, m):
    return ((x + m - 1) // m) * m


def mlp_kernel(x_ref, w0t_ref, b0_ref, whaug_ref, wfaug_ref, o_ref, *, sub, n_sub):
    # x:(2,tb)  w0t:(16,2)  b0:(16,1)  whaug:(8,17,16)  wfaug:(4,16)  out:(3,tb)
    # Activations are (features, batch) so the batch maps to lanes (lane-dense).
    # The lane axis of the tile is processed in `sub`-wide chunks to keep the
    # live set comfortably inside the 64-vreg file even for tb up to 2048.

    @pl.loop(0, n_sub)
    def _(c):
        off = pl.multiple_of(c * sub, sub)
        xc = x_ref[:, pl.ds(off, sub)]                       # (2, sub)

        # ---- Layer 0: K=2 contraction on the VPU (two broadcast FMAs) + bias.
        # Keep the max-subtraction here (x is unbounded).  The softmax
        # denominator is NOT computed here; it rides the next matmul instead.
        w0t = w0t_ref[...]                                    # (16, 2)
        h = (w0t[:, 0:1] * xc[0:1, :]
             + w0t[:, 1:2] * xc[1:2, :]
             + b0_ref[...])                                   # (16, sub)
        m = jnp.max(h, axis=0, keepdims=True)                 # XLU sublane max
        e = jnp.exp(h - m)                                    # unnormalized softmax

        # ---- Hidden layers: augmented weight [W.T ; ones] of shape (17,16).
        # One MXU matmul produces both W.T @ e (rows 0..15) and sum(e) (row 16),
        # i.e. the previous layer's softmax denominator for free on the MXU.
        # No max-subtraction: inputs are probabilities, |logits| <= max|W|, so
        # exp cannot overflow for PyTorch-default-scale weights.
        for i in range(NUM_HIDDEN):
            z = jnp.dot(whaug_ref[i], e,
                        preferred_element_type=jnp.float32)   # (17, sub)
            inv = pl.reciprocal(z[16:17, :], approx=True)      # EUP
            e = jnp.exp(z[0:16, :] * inv)

        # ---- Output layer: augmented weight [Wf.T ; ones] of shape (4,16).
        zf = jnp.dot(wfaug_ref[...], e,
                     preferred_element_type=jnp.float32)       # (4, sub)
        invf = pl.reciprocal(zf[OUT_DIM:OUT_DIM + 1, :], approx=True)
        logits = zf[0:OUT_DIM, :] * invf
        # sigmoid(x) = 0.5*tanh(x/2)+0.5 : tanh runs on the EUP, no divide.
        o_ref[:, pl.ds(off, sub)] = 0.5 * jnp.tanh(0.5 * logits) + 0.5


def prepare_params(w0, b0, wh, wf):
    """One-time weight packing (hoisted out of the forward pass): transpose and
    append the ones-rows that fold each softmax denominator into the next matmul."""
    w0t = jnp.asarray(w0, jnp.float32).T                         # (16, 2)
    b0c = jnp.asarray(b0, jnp.float32).reshape(NUM_NEURONS, 1)   # (16, 1)
    wht = jnp.transpose(jnp.asarray(wh, jnp.float32), (0, 2, 1))  # wht[i] = wh[i].T
    whaug = jnp.concatenate(
        [wht, jnp.ones((NUM_HIDDEN, 1, NUM_NEURONS), jnp.float32)], axis=1)  # (8,17,16)
    wfaug = jnp.concatenate(
        [jnp.asarray(wf, jnp.float32).T,
         jnp.ones((1, NUM_NEURONS), jnp.float32)], axis=0)        # (4, 16)
    return w0t, b0c, whaug, wfaug


def _tile_config(batch, tb_max):
    tb_max = max(LANE, (tb_max // LANE) * LANE)
    padded = _round_up(max(batch, 1), LANE)
    if padded >= 2 * LANE:
        # Guarantee >=2 tiles for batch >= 256 so the "parallel" axis actually
        # shards across both v7x TensorCores; cap at tb_max (VMEM is never the
        # constraint at this footprint — step-count amortization is).
        tb = min(tb_max, _round_up(padded // 2, LANE))
    else:
        tb = LANE
    n_tiles = pl.cdiv(batch, tb)
    # In-kernel lane sub-chunk width (bounds vreg pressure at large tb).
    if tb % 512 == 0:
        sub = 512
    elif tb % 256 == 0:
        sub = 256
    else:
        sub = LANE
    return tb, n_tiles, sub, tb // sub


def nn_forward_t(xt, params, *, tb_max=2048):
    """Primary (transposed, lane-dense) entry point: xt is (2, batch) float32,
    result is (3, batch).  No padding or transposition passes are added in the
    wrapper; ragged trailing batch tiles are handled by Pallas block masking."""
    w0t, b0c, whaug, wfaug = params
    batch = xt.shape[1]
    tb, n_tiles, sub, n_sub = _tile_config(batch, tb_max)

    kernel = functools.partial(mlp_kernel, sub=sub, n_sub=n_sub)
    return pl.pallas_call(
        kernel,
        out_shape=jax.ShapeDtypeStruct((OUT_DIM, batch), jnp.float32),
        grid_spec=pltpu.PrefetchScalarGridSpec(
            num_scalar_prefetch=0,
            grid=(n_tiles,),
            in_specs=[
                # Batch-tiled input (lane axis); partial last tile is masked.
                pl.BlockSpec((IN_DIM, tb), lambda i: (0, i)),
                # Weights: constant index_maps -> DMA'd once, VMEM-resident.
                pl.BlockSpec((NUM_NEURONS, IN_DIM), lambda i: (0, 0)),
                pl.BlockSpec((NUM_NEURONS, 1), lambda i: (0, 0)),
                pl.BlockSpec((NUM_HIDDEN, NUM_NEURONS + 1, NUM_NEURONS),
                             lambda i: (0, 0, 0)),
                pl.BlockSpec((OUT_DIM + 1, NUM_NEURONS), lambda i: (0, 0)),
            ],
            out_specs=pl.BlockSpec((OUT_DIM, tb), lambda i: (0, i)),
        ),
        compiler_params=pltpu.CompilerParams(
            # Batch tiles are independent -> shard across TensorCores.
            dimension_semantics=("parallel",)),
    )(xt, w0t, b0c, whaug, wfaug)


def nn_forward(x, params, *, tb_max=2048):
    """Convenience wrapper with the PyTorch layout: (batch, 2) -> (batch, 3).
    Prefer nn_forward_t in hot loops to avoid the two transpose passes."""
    return nn_forward_t(x.T, params, tb_max=tb_max).T


def init_params(key):
    # Mimic PyTorch Linear default init: U(-1/sqrt(fan_in), 1/sqrt(fan_in)).
    k0, kb, kh, kf = jax.random.split(key, 4)
    bound0 = 1.0 / jnp.sqrt(float(IN_DIM))
    boundh = 1.0 / jnp.sqrt(float(NUM_NEURONS))
    w0 = jax.random.uniform(k0, (IN_DIM, NUM_NEURONS), jnp.float32, -bound0, bound0)
    b0 = jax.random.uniform(kb, (1, NUM_NEURONS), jnp.float32, -bound0, bound0)
    wh = jax.random.uniform(kh, (NUM_HIDDEN, NUM_NEURONS, NUM_NEURONS),
                            jnp.float32, -boundh, boundh)
    wf = jax.random.uniform(kf, (NUM_NEURONS, OUT_DIM), jnp.float32, -boundh, boundh)
    return w0, b0, wh, wf


def reference_forward(x, w0, b0, wh, wf):
    # Pure-JAX reference mirroring the PyTorch module.
    h = jax.nn.softmax(x @ w0 + b0, axis=-1)
    for i in range(NUM_HIDDEN):
        h = jax.nn.softmax(h @ wh[i], axis=-1)
    return jax.nn.sigmoid(h @ wf)


if __name__ == "__main__":
    key = jax.random.PRNGKey(0)
    kx, kp = jax.random.split(key)
    w0, b0, wh, wf = init_params(kp)
    params = prepare_params(w0, b0, wh, wf)

    # Small single-(ragged-)tile batch through the PyTorch-layout wrapper.
    batch = 8
    x = jax.random.normal(kx, (batch, IN_DIM), dtype=jnp.float32)
    out = jax.block_until_ready(nn_forward(x, params))
    ref = reference_forward(x, w0, b0, wh, wf)
    assert out.shape == (batch, OUT_DIM)
    # Tolerance relaxed vs 1e-5 because softmax uses the EUP approx reciprocal.
    assert jnp.allclose(out, ref, atol=2e-3, rtol=0.0), \
        float(jnp.max(jnp.abs(out - ref)))

    # Multi-tile with a ragged last tile, transposed (zero-copy) entry point.
    batch2 = 200
    x2 = jax.random.normal(jax.random.PRNGKey(1), (batch2, IN_DIM), dtype=jnp.float32)
    out2 = jax.block_until_ready(nn_forward_t(x2.T, params))
    ref2 = reference_forward(x2, w0, b0, wh, wf).T
    assert out2.shape == (OUT_DIM, batch2)
    assert jnp.allclose(out2, ref2, atol=2e-3, rtol=0.0), \
        float(jnp.max(jnp.abs(out2 - ref2)))

    # Larger batch: exercises the big tile + in-kernel lane sub-chunk loop.
    batch3 = 2500
    x3 = jax.random.normal(jax.random.PRNGKey(2), (batch3, IN_DIM), dtype=jnp.float32)
    out3 = jax.block_until_ready(nn_forward_t(x3.T, params))
    ref3 = reference_forward(x3, w0, b0, wh, wf).T
    assert out3.shape == (OUT_DIM, batch3)
    assert jnp.allclose(out3, ref3, atol=2e-3, rtol=0.0), \
        float(jnp.max(jnp.abs(out3 - ref3)))

    print("KERNEL_OK")
</pallas_src>

<mosaic_0001>
module attributes {stable_mosaic.version = 11 : i64} {
  func.func @mlp_kernel(%arg0: i32, %arg1: memref<2x128xf32, #tpu.memory_space<vmem>>, %arg2: memref<16x2xf32, #tpu.memory_space<vmem>>, %arg3: memref<16x1xf32, #tpu.memory_space<vmem>>, %arg4: memref<8x17x16xf32, #tpu.memory_space<vmem>>, %arg5: memref<4x16xf32, #tpu.memory_space<vmem>>, %arg6: memref<3x128xf32, #tpu.memory_space<vmem>>) attributes {dimension_semantics = [#tpu.dimension_semantics<parallel>], iteration_bounds = array<i64: 1>, scalar_prefetch = 0 : i64, scratch_operands = 0 : i64, tpu.core_type = #tpu.core_type<tc>, window_params = [{transform_indices = @transform_0, window_bounds = array<i64: 2, 128>}, {pipeline_mode = #tpu.pipeline_mode<synchronous>, transform_indices = @transform_1, window_bounds = array<i64: 16, 2>}, {pipeline_mode = #tpu.pipeline_mode<synchronous>, transform_indices = @transform_2, window_bounds = array<i64: 16, 1>}, {pipeline_mode = #tpu.pipeline_mode<synchronous>, transform_indices = @transform_3, window_bounds = array<i64: 8, 17, 16>}, {pipeline_mode = #tpu.pipeline_mode<synchronous>, transform_indices = @transform_4, window_bounds = array<i64: 4, 16>}, {transform_indices = @transform_5, window_bounds = array<i64: 3, 128>}]} {
    %c0_i32 = arith.constant 0 : i32
    %c1_i32 = arith.constant 1 : i32
    %0 = arith.muli %c0_i32, %c1_i32 : i32
    %c0_i32_0 = arith.constant 0 : i32
    %1 = arith.addi %c0_i32_0, %0 : i32
    %c128_i32 = arith.constant 128 : i32
    %2 = arith.muli %1, %c128_i32 : i32
    %3 = tpu.assume_multiple %2, 128 : i32
    %c0 = arith.constant 0 : index
    %4 = arith.index_cast %3 : i32 to index
    %5 = vector.load %arg1[%c0, %4] : memref<2x128xf32, #tpu.memory_space<vmem>>, vector<2x128xf32>
    %c0_1 = arith.constant 0 : index
    %c0_2 = arith.constant 0 : index
    %6 = vector.load %arg2[%c0_1, %c0_2] : memref<16x2xf32, #tpu.memory_space<vmem>>, vector<16x2xf32>
    %7 = vector.extract_strided_slice %6 {offsets = [0, 0], sizes = [16, 1], strides = [1, 1]} : vector<16x2xf32> to vector<16x1xf32>
    %8 = vector.extract_strided_slice %5 {offsets = [0, 0], sizes = [1, 128], strides = [1, 1]} : vector<2x128xf32> to vector<1x128xf32>
    %9 = vector.broadcast %7 : vector<16x1xf32> to vector<16x128xf32>
    %10 = vector.broadcast %8 : vector<1x128xf32> to vector<16x128xf32>
    %11 = arith.mulf %9, %10 : vector<16x128xf32>
    %12 = vector.extract_strided_slice %6 {offsets = [0, 1], sizes = [16, 1], strides = [1, 1]} : vector<16x2xf32> to vector<16x1xf32>
    %13 = vector.extract_strided_slice %5 {offsets = [1, 0], sizes = [1, 128], strides = [1, 1]} : vector<2x128xf32> to vector<1x128xf32>
    %14 = vector.broadcast %12 : vector<16x1xf32> to vector<16x128xf32>
    %15 = vector.broadcast %13 : vector<1x128xf32> to vector<16x128xf32>
    %16 = arith.mulf %14, %15 : vector<16x128xf32>
    %17 = arith.addf %11, %16 : vector<16x128xf32>
    %c0_3 = arith.constant 0 : index
    %c0_4 = arith.constant 0 : index
    %18 = vector.load %arg3[%c0_3, %c0_4] : memref<16x1xf32, #tpu.memory_space<vmem>>, vector<16x1xf32>
    %19 = vector.broadcast %18 : vector<16x1xf32> to vector<16x128xf32>
    %20 = arith.addf %17, %19 : vector<16x128xf32>
    %cst = arith.constant dense<0xFF800000> : vector<128xf32>
    %21 = vector.multi_reduction <maximumf>, %20, %cst [0] : vector<16x128xf32> to vector<128xf32>
    %22 = vector.shape_cast %21 : vector<128xf32> to vector<1x128xf32>
    %23 = vector.broadcast %22 : vector<1x128xf32> to vector<16x128xf32>
    %24 = arith.subf %20, %23 : vector<16x128xf32>
    %25 = math.exp %24 : vector<16x128xf32>
    %c0_5 = arith.constant 0 : index
    %c0_6 = arith.constant 0 : index
    %c0_7 = arith.constant 0 : index
    %26 = vector.load %arg4[%c0_5, %c0_6, %c0_7] : memref<8x17x16xf32, #tpu.memory_space<vmem>>, vector<1x17x16xf32>
    %27 = vector.shape_cast %26 : vector<1x17x16xf32> to vector<17x16xf32>
    %cst_8 = arith.constant dense<0.000000e+00> : vector<17x128xf32>
    %28 = tpu.matmul %27, %25, %cst_8 {dimension_numbers = #tpu.dot_dimension_numbers<[1], [0], [0], [1], [0, 0, 1, 1], [], []>} : vector<17x16xf32>, vector<16x128xf32>, vector<17x128xf32> -> vector<17x128xf32>
    %29 = vector.extract_strided_slice %28 {offsets = [16, 0], sizes = [1, 128], strides = [1, 1]} : vector<17x128xf32> to vector<1x128xf32>
    %30 = tpu.reciprocal %29 {approx = true} : vector<1x128xf32> -> vector<1x128xf32>
    %31 = vector.extract_strided_slice %28 {offsets = [0, 0], sizes = [16, 128], strides = [1, 1]} : vector<17x128xf32> to vector<16x128xf32>
    %32 = vector.broadcast %30 : vector<1x128xf32> to vector<16x128xf32>
    %33 = arith.mulf %31, %32 : vector<16x128xf32>
    %34 = math.exp %33 : vector<16x128xf32>
    %c1 = arith.constant 1 : index
    %c0_9 = arith.constant 0 : index
    %c0_10 = arith.constant 0 : index
    %35 = vector.load %arg4[%c1, %c0_9, %c0_10] : memref<8x17x16xf32, #tpu.memory_space<vmem>>, vector<1x17x16xf32>
    %36 = vector.shape_cast %35 : vector<1x17x16xf32> to vector<17x16xf32>
    %cst_11 = arith.constant dense<0.000000e+00> : vector<17x128xf32>
    %37 = tpu.matmul %36, %34, %cst_11 {dimension_numbers = #tpu.dot_dimension_numbers<[1], [0], [0], [1], [0, 0, 1, 1], [], []>} : vector<17x16xf32>, vector<16x128xf32>, vector<17x128xf32> -> vector<17x128xf32>
    %38 = vector.extract_strided_slice %37 {offsets = [16, 0], sizes = [1, 128], strides = [1, 1]} : vector<17x128xf32> to vector<1x128xf32>
    %39 = tpu.reciprocal %38 {approx = true} : vector<1x128xf32> -> vector<1x128xf32>
    %40 = vector.extract_strided_slice %37 {offsets = [0, 0], sizes = [16, 128], strides = [1, 1]} : vector<17x128xf32> to vector<16x128xf32>
    %41 = vector.broadcast %39 : vector<1x128xf32> to vector<16x128xf32>
    %42 = arith.mulf %40, %41 : vector<16x128xf32>
    %43 = math.exp %42 : vector<16x128xf32>
    %c2 = arith.constant 2 : index
    %c0_12 = arith.constant 0 : index
    %c0_13 = arith.constant 0 : index
    %44 = vector.load %arg4[%c2, %c0_12, %c0_13] : memref<8x17x16xf32, #tpu.memory_space<vmem>>, vector<1x17x16xf32>
    %45 = vector.shape_cast %44 : vector<1x17x16xf32> to vector<17x16xf32>
    %cst_14 = arith.constant dense<0.000000e+00> : vector<17x128xf32>
    %46 = tpu.matmul %45, %43, %cst_14 {dimension_numbers = #tpu.dot_dimension_numbers<[1], [0], [0], [1], [0, 0, 1, 1], [], []>} : vector<17x16xf32>, vector<16x128xf32>, vector<17x128xf32> -> vector<17x128xf32>
    %47 = vector.extract_strided_slice %46 {offsets = [16, 0], sizes = [1, 128], strides = [1, 1]} : vector<17x128xf32> to vector<1x128xf32>
    %48 = tpu.reciprocal %47 {approx = true} : vector<1x128xf32> -> vector<1x128xf32>
    %49 = vector.extract_strided_slice %46 {offsets = [0, 0], sizes = [16, 128], strides = [1, 1]} : vector<17x128xf32> to vector<16x128xf32>
    %50 = vector.broadcast %48 : vector<1x128xf32> to vector<16x128xf32>
    %51 = arith.mulf %49, %50 : vector<16x128xf32>
    %52 = math.exp %51 : vector<16x128xf32>
    %c3 = arith.constant 3 : index
    %c0_15 = arith.constant 0 : index
    %c0_16 = arith.constant 0 : index
    %53 = vector.load %arg4[%c3, %c0_15, %c0_16] : memref<8x17x16xf32, #tpu.memory_space<vmem>>, vector<1x17x16xf32>
    %54 = vector.shape_cast %53 : vector<1x17x16xf32> to vector<17x16xf32>
    %cst_17 = arith.constant dense<0.000000e+00> : vector<17x128xf32>
    %55 = tpu.matmul %54, %52, %cst_17 {dimension_numbers = #tpu.dot_dimension_numbers<[1], [0], [0], [1], [0, 0, 1, 1], [], []>} : vector<17x16xf32>, vector<16x128xf32>, vector<17x128xf32> -> vector<17x128xf32>
    %56 = vector.extract_strided_slice %55 {offsets = [16, 0], sizes = [1, 128], strides = [1, 1]} : vector<17x128xf32> to vector<1x128xf32>
    %57 = tpu.reciprocal %56 {approx = true} : vector<1x128xf32> -> vector<1x128xf32>
    %58 = vector.extract_strided_slice %55 {offsets = [0, 0], sizes = [16, 128], strides = [1, 1]} : vector<17x128xf32> to vector<16x128xf32>
    %59 = vector.broadcast %57 : vector<1x128xf32> to vector<16x128xf32>
    %60 = arith.mulf %58, %59 : vector<16x128xf32>
    %61 = math.exp %60 : vector<16x128xf32>
    %c4 = arith.constant 4 : index
    %c0_18 = arith.constant 0 : index
    %c0_19 = arith.constant 0 : index
    %62 = vector.load %arg4[%c4, %c0_18, %c0_19] : memref<8x17x16xf32, #tpu.memory_space<vmem>>, vector<1x17x16xf32>
    %63 = vector.shape_cast %62 : vector<1x17x16xf32> to vector<17x16xf32>
    %cst_20 = arith.constant dense<0.000000e+00> : vector<17x128xf32>
    %64 = tpu.matmul %63, %61, %cst_20 {dimension_numbers = #tpu.dot_dimension_numbers<[1], [0], [0], [1], [0, 0, 1, 1], [], []>} : vector<17x16xf32>, vector<16x128xf32>, vector<17x128xf32> -> vector<17x128xf32>
    %65 = vector.extract_strided_slice %64 {offsets = [16, 0], sizes = [1, 128], strides = [1, 1]} : vector<17x128xf32> to vector<1x128xf32>
    %66 = tpu.reciprocal %65 {approx = true} : vector<1x128xf32> -> vector<1x128xf32>
    %67 = vector.extract_strided_slice %64 {offsets = [0, 0], sizes = [16, 128], strides = [1, 1]} : vector<17x128xf32> to vector<16x128xf32>
    %68 = vector.broadcast %66 : vector<1x128xf32> to vector<16x128xf32>
    %69 = arith.mulf %67, %68 : vector<16x128xf32>
    %70 = math.exp %69 : vector<16x128xf32>
    %c5 = arith.constant 5 : index
    %c0_21 = arith.constant 0 : index
    %c0_22 = arith.constant 0 : index
    %71 = vector.load %arg4[%c5, %c0_21, %c0_22] : memref<8x17x16xf32, #tpu.memory_space<vmem>>, vector<1x17x16xf32>
    %72 = vector.shape_cast %71 : vector<1x17x16xf32> to vector<17x16xf32>
    %cst_23 = arith.constant dense<0.000000e+00> : vector<17x128xf32>
    %73 = tpu.matmul %72, %70, %cst_23 {dimension_numbers = #tpu.dot_dimension_numbers<[1], [0], [0], [1], [0, 0, 1, 1], [], []>} : vector<17x16xf32>, vector<16x128xf32>, vector<17x128xf32> -> vector<17x128xf32>
    %74 = vector.extract_strided_slice %73 {offsets = [16, 0], sizes = [1, 128], strides = [1, 1]} : vector<17x128xf32> to vector<1x128xf32>
    %75 = tpu.reciprocal %74 {approx = true} : vector<1x128xf32> -> vector<1x128xf32>
    %76 = vector.extract_strided_slice %73 {offsets = [0, 0], sizes = [16, 128], strides = [1, 1]} : vector<17x128xf32> to vector<16x128xf32>
    %77 = vector.broadcast %75 : vector<1x128xf32> to vector<16x128xf32>
    %78 = arith.mulf %76, %77 : vector<16x128xf32>
    %79 = math.exp %78 : vector<16x128xf32>
    %c6 = arith.constant 6 : index
    %c0_24 = arith.constant 0 : index
    %c0_25 = arith.constant 0 : index
    %80 = vector.load %arg4[%c6, %c0_24, %c0_25] : memref<8x17x16xf32, #tpu.memory_space<vmem>>, vector<1x17x16xf32>
    %81 = vector.shape_cast %80 : vector<1x17x16xf32> to vector<17x16xf32>
    %cst_26 = arith.constant dense<0.000000e+00> : vector<17x128xf32>
    %82 = tpu.matmul %81, %79, %cst_26 {dimension_numbers = #tpu.dot_dimension_numbers<[1], [0], [0], [1], [0, 0, 1, 1], [], []>} : vector<17x16xf32>, vector<16x128xf32>, vector<17x128xf32> -> vector<17x128xf32>
    %83 = vector.extract_strided_slice %82 {offsets = [16, 0], sizes = [1, 128], strides = [1, 1]} : vector<17x128xf32> to vector<1x128xf32>
    %84 = tpu.reciprocal %83 {approx = true} : vector<1x128xf32> -> vector<1x128xf32>
    %85 = vector.extract_strided_slice %82 {offsets = [0, 0], sizes = [16, 128], strides = [1, 1]} : vector<17x128xf32> to vector<16x128xf32>
    %86 = vector.broadcast %84 : vector<1x128xf32> to vector<16x128xf32>
    %87 = arith.mulf %85, %86 : vector<16x128xf32>
    %88 = math.exp %87 : vector<16x128xf32>
    %c7 = arith.constant 7 : index
    %c0_27 = arith.constant 0 : index
    %c0_28 = arith.constant 0 : index
    %89 = vector.load %arg4[%c7, %c0_27, %c0_28] : memref<8x17x16xf32, #tpu.memory_space<vmem>>, vector<1x17x16xf32>
    %90 = vector.shape_cast %89 : vector<1x17x16xf32> to vector<17x16xf32>
    %cst_29 = arith.constant dense<0.000000e+00> : vector<17x128xf32>
    %91 = tpu.matmul %90, %88, %cst_29 {dimension_numbers = #tpu.dot_dimension_numbers<[1], [0], [0], [1], [0, 0, 1, 1], [], []>} : vector<17x16xf32>, vector<16x128xf32>, vector<17x128xf32> -> vector<17x128xf32>
    %92 = vector.extract_strided_slice %91 {offsets = [16, 0], sizes = [1, 128], strides = [1, 1]} : vector<17x128xf32> to vector<1x128xf32>
    %93 = tpu.reciprocal %92 {approx = true} : vector<1x128xf32> -> vector<1x128xf32>
    %94 = vector.extract_strided_slice %91 {offsets = [0, 0], sizes = [16, 128], strides = [1, 1]} : vector<17x128xf32> to vector<16x128xf32>
    %95 = vector.broadcast %93 : vector<1x128xf32> to vector<16x128xf32>
    %96 = arith.mulf %94, %95 : vector<16x128xf32>
    %97 = math.exp %96 : vector<16x128xf32>
    %c0_30 = arith.constant 0 : index
    %c0_31 = arith.constant 0 : index
    %98 = vector.load %arg5[%c0_30, %c0_31] : memref<4x16xf32, #tpu.memory_space<vmem>>, vector<4x16xf32>
    %cst_32 = arith.constant dense<0.000000e+00> : vector<4x128xf32>
    %99 = tpu.matmul %98, %97, %cst_32 {dimension_numbers = #tpu.dot_dimension_numbers<[1], [0], [0], [1], [0, 0, 1, 1], [], []>} : vector<4x16xf32>, vector<16x128xf32>, vector<4x128xf32> -> vector<4x128xf32>
    %100 = vector.extract_strided_slice %99 {offsets = [3, 0], sizes = [1, 128], strides = [1, 1]} : vector<4x128xf32> to vector<1x128xf32>
    %101 = tpu.reciprocal %100 {approx = true} : vector<1x128xf32> -> vector<1x128xf32>
    %102 = vector.extract_strided_slice %99 {offsets = [0, 0], sizes = [3, 128], strides = [1, 1]} : vector<4x128xf32> to vector<3x128xf32>
    %103 = vector.broadcast %101 : vector<1x128xf32> to vector<3x128xf32>
    %104 = arith.mulf %102, %103 : vector<3x128xf32>
    %cst_33 = arith.constant 5.000000e-01 : f32
    %105 = vector.broadcast %cst_33 : f32 to vector<3x128xf32>
    %106 = arith.mulf %105, %104 : vector<3x128xf32>
    %107 = math.tanh %106 : vector<3x128xf32>
    %cst_34 = arith.constant 5.000000e-01 : f32
    %108 = vector.broadcast %cst_34 : f32 to vector<3x128xf32>
    %109 = arith.mulf %108, %107 : vector<3x128xf32>
    %cst_35 = arith.constant 5.000000e-01 : f32
    %110 = vector.broadcast %cst_35 : f32 to vector<3x128xf32>
    %111 = arith.addf %109, %110 : vector<3x128xf32>
    %c0_36 = arith.constant 0 : index
    %112 = arith.index_cast %3 : i32 to index
    %113 = vector.load %arg6[%c0_36, %112] : memref<3x128xf32, #tpu.memory_space<vmem>>, vector<3x128xf32>
    tpu.vector_store %arg6[%c0_36, %112], %111 {strides = array<i32>} : memref<3x128xf32, #tpu.memory_space<vmem>>, vector<3x128xf32>,
    %c1_i32_37 = arith.constant 1 : i32
    return
  }
  func.func @transform_0(%arg0: i32) -> (i32, i32) {
    %c0_i32 = arith.constant 0 : i32
    %c0_i32_0 = arith.constant 0 : i32
    return %c0_i32, %arg0 : i32, i32
  }
  func.func @transform_1(%arg0: i32) -> (i32, i32) {
    %c0_i32 = arith.constant 0 : i32
    %c0_i32_0 = arith.constant 0 : i32
    %c0_i32_1 = arith.constant 0 : i32
    return %c0_i32, %c0_i32_0 : i32, i32
  }
  func.func @transform_2(%arg0: i32) -> (i32, i32) {
    %c0_i32 = arith.constant 0 : i32
    %c0_i32_0 = arith.constant 0 : i32
    %c0_i32_1 = arith.constant 0 : i32
    return %c0_i32, %c0_i32_0 : i32, i32
  }
  func.func @transform_3(%arg0: i32) -> (i32, i32, i32) {
    %c0_i32 = arith.constant 0 : i32
    %c0_i32_0 = arith.constant 0 : i32
    %c0_i32_1 = arith.constant 0 : i32
    %c0_i32_2 = arith.constant 0 : i32
    return %c0_i32, %c0_i32_0, %c0_i32_1 : i32, i32, i32
  }
  func.func @transform_4(%arg0: i32) -> (i32, i32) {
    %c0_i32 = arith.constant 0 : i32
    %c0_i32_0 = arith.constant 0 : i32
    %c0_i32_1 = arith.constant 0 : i32
    return %c0_i32, %c0_i32_0 : i32, i32
  }
  func.func @transform_5(%arg0: i32) -> (i32, i32) {
    %c0_i32 = arith.constant 0 : i32
    %c0_i32_0 = arith.constant 0 : i32
    return %c0_i32, %arg0 : i32, i32
  }
}

</mosaic_0001>

<bundles_post_ra>
// kernel: tpu_custom_call.1
= control target key start
LH: loop header
LB: loop body
LE: loop exit
PB: predicated region body
PF: predicated region fallthrough
CT: control target
= control target key end

     0   :  { %v1300_v1 = vmov 1   ;;  %v1301_v2 = vmov 0   ;;  %s1537_s0 = inlined_call_operand.vmem [shape: f32[2,8], index: 0, kind: input, shape index: {}]   ;;  %s1538_s1 = inlined_call_operand.vmem [shape: f32[16,2], index: 1, kind: input, shape index: {}]   ;;  %s1539_s2 = inlined_call_operand.vmem [shape: f32[16,1], index: 2, kind: input, shape index: {}]   ;;  %s1540_s3 = inlined_call_operand.vmem [shape: f32[8,17,16], index: 3, kind: input, shape index: {}]   ;;  %s1541_s4 = inlined_call_operand.vmem [shape: f32[4,16], index: 4, kind: input, shape index: {}]   ;;  %s1542_s5 = inlined_call_operand.hbm [shape: f32[3,8], index: 5, kind: output, shape index: {}]  }
   0x1   :  { %v22_v0 = vld [vmem:[%s1538_s1] sm:$0xff]  ;;  %1220 = vset.pattern.permute.xlu1 %v1300_v1  ;;  %1219 = vset.pattern.permute.xlu0 %v1301_v2 }
   0x2   :  { %10 = vsyncpa [#allocation3], 0  ;;  %41 = vperm.xlu1 %1220, %v22_v0   ;;  %26 = vperm.xlu0 %1219, %v22_v0   ;;  %v23_v3 = vld [vmem:[%s1538_s1 + $0x8] sm:$0xff]  ;;  %v56_v4 = vld [vmem:[%s1539_s2] sm:$0xff]  ;;  %v1302_v6 = vmov 0.0   ;;  %vm1303_vm0 = vmmov 0   ;;  %v34_v7 = vlaneseq }
   0x3   :  { %v57_v5 = vld [vmem:[%s1539_s2 + $0x8] sm:$0xff]  ;;  %1103 = vmatprep.subr.mxu0 %v1302_v6  ;;  %1116 = vmatprep.subr.mxu1 %v1302_v6  ;;  %v21_v11 = vld [vmem:[%s1537_s0] sm:$0x3]  ;;  %vm86_vm1 = vcmask 130048   ;;  %v85_v43 = vld [vmem:[%s1540_s3 + $0x10] sm:$0x1] }
   0x4   :  { %1107 = vmatprep.mubr.msk.f32.mxu0 %vm1303_vm0, %v1302_v6  ;;  %1120 = vmatprep.mubr.msk.f32.mxu1 %vm1303_vm0, %v1302_v6  ;;  %v1353_v8 = vshrl.u32 %v34_v7, 7  ;;  %v83_v40 = vld [vmem:[%s1540_s3] sm:$0xff]  ;;  %v84_v42 = vld [vmem:[%s1540_s3 + $0x8] sm:$0xff]  ;;  %v1017_v57 = vld [vmem:[%s1540_s3 + $0x18] sm:$0xff]  ;;  %s1304_s21 = smov [#allocation2]  }
   0x5   :  { %v1018_v59 = vld [vmem:[%s1540_s3 + $0x20] sm:$0xff]  ;;  %v1019_v60 = vld [vmem:[%s1540_s3 + $0x28] sm:$0x1]  ;;  %s1006_s22 = sshll.u32 %s1304_s21, 4  ;;  %s1007_s22 = int_to_ptr.vmem [resolvable:$true] %s1006_s22 }
   0x6   :  { %45 = vperm.xlu1 %1220, %v23_v3   ;;  %31 = vperm.xlu0 %1219, %v23_v3   ;;  %v1356_v9 = vsub.s32 0, %v1353_v8  ;;  %v50_v10 = vsub.s32 1, %v1353_v8  ;;  %p1283_p1 = scmp.lt.s32.totalorder %s1007_s22, %s1007_s22 }
   0x8   :  { %v51_v12 = vrot.slane %v21_v11, %v50_v10  ;;  %v37_v13 = vrot.slane %v21_v11, %v1356_v9 }
   0xa   :  { %1221 = vset.pattern.permute.xlu1 %v1301_v2  ;;  %60 = vperm.xlu0 %1219, %v56_v4  }
   0xb   :  { %65 = vperm.xlu1 %1221, %v57_v5  }
  0x7d   :  { %v42_v14 = vpop.permute.xlu1 %41  ;;  %v27_v15 = vpop.permute.xlu0 %26 }
  0x7e   :  { %v52_v16 = vmul.f32 %v51_v12, %v42_v14  ;;  %v38_v17 = vmul.f32 %v37_v13, %v27_v15  ;;  %v1024_v15 = vld [vmem:[%s1540_s3 + $0x38] sm:$0xff] }
  0x80   :  { %v54_v22 = vadd.f32 %v52_v16, %v38_v17  ;;  %v1025_v16 = vld [vmem:[%s1540_s3 + $0x40] sm:$0x1] }
  0x81   :  { %v46_v18 = vpop.permute.xlu1 %45  ;;  %v32_v19 = vpop.permute.xlu0 %31 }
  0x82   :  { %v53_v20 = vmul.f32 %v51_v12, %v46_v18  ;;  %v39_v21 = vmul.f32 %v37_v13, %v32_v19  ;;  %v1023_v13 = vld [vmem:[%s1540_s3 + $0x30] sm:$0xff] }
  0x84   :  { %v55_v23 = vadd.f32 %v53_v20, %v39_v21 }
  0x85   :  { %v61_v24 = vpop.permute.xlu0 %60 }
  0x86   :  { %v68_v25 = vadd.f32 %v61_v24, %v54_v22  ;;  %v66_v26 = vpop.permute.xlu1 %65 }
  0x87   :  { %v69_v27 = vadd.f32 %v66_v26, %v55_v23 }
  0x89   :  { %v70_v28 = vmax.f32 %v68_v25, %v69_v27 }
  0x8b   :  { %v71_v29 = vrot.slane %v70_v28, 4 }
  0x8d   :  { %v72_v30 = vmax.f32 %v70_v28, %v71_v29 }
  0x8f   :  { %v73_v31 = vrot.slane %v72_v30, 2 }
  0x91   :  { %v74_v32 = vmax.f32 %v72_v30, %v73_v31  ;;  %v1029_v30 = vld [vmem:[%s1540_s3 + $0x48] sm:$0xff] }
  0x93   :  { %v75_v33 = vrot.slane %v74_v32, 1 }
  0x95   :  { %v76_v34 = vmax.f32 %v74_v32, %v75_v33  ;;  %v1030_v32 = vld [vmem:[%s1540_s3 + $0x50] sm:$0xff]  ;;  %v1031_v33 = vld [vmem:[%s1540_s3 + $0x58] sm:$0x1] }
  0x97   :  { %v77_v35 = vsub.f32 %v68_v25, %v76_v34  ;;  %v78_v36 = vsub.f32 %v69_v27, %v76_v34 }
  0x99   :  { %v81_v37 = vmul.f32 1.442695, %v78_v36  ;;  %v79_v38 = vmul.f32 1.442695, %v77_v35 }
  0x9b   :  { %1222 = vpow2.f32 %v81_v37 }
  0x9c   :  { %1224 = vpow2.f32 %v79_v38 }
  0xa8   :  { %v1223_v39 = vpop.eup %1222 }
  0xa9   :  { %1104 = vmatpush3.msra.mxu0 %v1223_v39  ;;  %v1225_v41 = vpop.eup %1224 }
  0xaa   :  { %1105 = vmatprep.subr.mxu0 %v1302_v6 }
  0xab   :  { %1106 = vmatpush3.msra.mxu0 %v1225_v41 }
  0xac   :  { %1108 = vmatmul.mubr.msk.f32.vlgmr.msra.gmra.mxu0 %vm86_vm1, %v83_v40  ;;  %1129 = vmatprep.subr.mxu0 %v1302_v6 }
  0xad   :  { %1110 = vmatprep.mubr.msk.f32.mxu0 %vm1303_vm0, %v1302_v6 }
  0xb0   :  { %1111 = vmatmul.mubr.msk.f32.gmra.mxu0 %vm86_vm1, %v84_v42 }
  0xb1   :  { %1113 = vmatprep.mubr.msk.f32.mxu0 %vm1303_vm0, %v1302_v6 }
  0xb4   :  { %1114 = vmatmul.mubr.msk.f32.gmra.mxu0 %vm86_vm1, %v85_v43 }
  0xb5   :  { %1133 = vmatprep.mubr.msk.f32.mxu0 %vm1303_vm0, %v1302_v6 }
 0x16c   :  { %v162_v44 = vpop.f32.mrf.mxu0 }
 0x16e   :  { %v1109_v45 = vpop.f32.mrf.mxu0 }
 0x170   :  { %v167_v46 = vpop.f32.mrf.mxu0 }
 0x172   :  { %v1112_v47 = vpop.f32.mrf.mxu0 }
 0x173   :  { %v1035_v47 = vld [vmem:[%s1540_s3 + $0x60] sm:$0xff] }
 0x174   :  { %v172_v48 = vpop.f32.mrf.mxu0 }
 0x175   :  { %1226 = vrcp.f32 %v172_v48 }
 0x176   :  { %v1115_v49 = vpop.f32.mrf.mxu0 }
 0x177   :  { %v1036_v49 = vld [vmem:[%s1540_s3 + $0x68] sm:$0xff] }
 0x182   :  { %v1227_v50 = vpop.eup %1226 }
 0x183   :  { %v180_v51 = vrot.slane %v1227_v50, %v1356_v9  ;;  %v1037_v50 = vld [vmem:[%s1540_s3 + $0x70] sm:$0x1] }
 0x185   :  { %v181_v52 = vmul.f32 %v180_v51, %v162_v44  ;;  %v182_v53 = vmul.f32 %v180_v51, %v167_v46 }
 0x187   :  { %v185_v54 = vmul.f32 1.442695, %v182_v53  ;;  %v183_v55 = vmul.f32 1.442695, %v181_v52 }
 0x189   :  { %1228 = vpow2.f32 %v185_v54 }
 0x18a   :  { %1230 = vpow2.f32 %v183_v55 }
 0x196   :  { %v1229_v56 = vpop.eup %1228 }
 0x197   :  { %1117 = vmatpush3.msra.mxu1 %v1229_v56  ;;  %v1231_v58 = vpop.eup %1230 }
 0x198   :  { %1118 = vmatprep.subr.mxu1 %v1302_v6 }
 0x199   :  { %1119 = vmatpush3.msra.mxu1 %v1231_v58 }
 0x19a   :  { %1121 = vmatmul.mubr.msk.f32.vlgmr.msra.gmra.mxu1 %vm86_vm1, %v1017_v57  ;;  %1142 = vmatprep.subr.mxu1 %v1302_v6 }
 0x19b   :  { %1123 = vmatprep.mubr.msk.f32.mxu1 %vm1303_vm0, %v1302_v6 }
 0x19e   :  { %1124 = vmatmul.mubr.msk.f32.gmra.mxu1 %vm86_vm1, %v1018_v59 }
 0x19f   :  { %1126 = vmatprep.mubr.msk.f32.mxu1 %vm1303_vm0, %v1302_v6 }
 0x1a2   :  { %1127 = vmatmul.mubr.msk.f32.gmra.mxu1 %vm86_vm1, %v1019_v60 }
 0x1a3   :  { %1146 = vmatprep.mubr.msk.f32.mxu1 %vm1303_vm0, %v1302_v6 }
 0x25a   :  { %v266_v61 = vpop.f32.mrf.mxu1 }
 0x25c   :  { %v1122_v62 = vpop.f32.mrf.mxu1 }
 0x25e   :  { %v271_v63 = vpop.f32.mrf.mxu1 }
 0x260   :  { %v1125_v0 = vpop.f32.mrf.mxu1 }
 0x261   :  { %v1041_v0 = vld [vmem:[%s1540_s3 + $0x78] sm:$0xff] }
 0x262   :  { %v276_v1 = vpop.f32.mrf.mxu1 }
 0x263   :  { %1232 = vrcp.f32 %v276_v1 }
 0x264   :  { %v1128_v2 = vpop.f32.mrf.mxu1 }
 0x265   :  { %v1042_v2 = vld [vmem:[%s1540_s3 + $0x80] sm:$0xff] }
 0x270   :  { %v1233_v3 = vpop.eup %1232 }
 0x271   :  { %v284_v4 = vrot.slane %v1233_v3, %v1356_v9  ;;  %v1043_v3 = vld [vmem:[%s1540_s3 + $0x88] sm:$0x1] }
 0x273   :  { %v285_v5 = vmul.f32 %v284_v4, %v266_v61  ;;  %v286_v7 = vmul.f32 %v284_v4, %v271_v63 }
 0x275   :  { %v289_v10 = vmul.f32 1.442695, %v286_v7  ;;  %v287_v11 = vmul.f32 1.442695, %v285_v5 }
 0x277   :  { %1234 = vpow2.f32 %v289_v10 }
 0x278   :  { %1236 = vpow2.f32 %v287_v11 }
 0x284   :  { %v1235_v12 = vpop.eup %1234 }
 0x285   :  { %1130 = vmatpush3.msra.mxu0 %v1235_v12  ;;  %v1237_v14 = vpop.eup %1236 }
 0x286   :  { %1131 = vmatprep.subr.mxu0 %v1302_v6 }
 0x287   :  { %1132 = vmatpush3.msra.mxu0 %v1237_v14 }
 0x288   :  { %1134 = vmatmul.mubr.msk.f32.vlgmr.msra.gmra.mxu0 %vm86_vm1, %v1023_v13  ;;  %1155 = vmatprep.subr.mxu0 %v1302_v6 }
 0x289   :  { %1136 = vmatprep.mubr.msk.f32.mxu0 %vm1303_vm0, %v1302_v6 }
 0x28c   :  { %1137 = vmatmul.mubr.msk.f32.gmra.mxu0 %vm86_vm1, %v1024_v15 }
 0x28d   :  { %1139 = vmatprep.mubr.msk.f32.mxu0 %vm1303_vm0, %v1302_v6 }
 0x290   :  { %1140 = vmatmul.mubr.msk.f32.gmra.mxu0 %vm86_vm1, %v1025_v16 }
 0x291   :  { %1159 = vmatprep.mubr.msk.f32.mxu0 %vm1303_vm0, %v1302_v6 }
 0x348   :  { %v370_v17 = vpop.f32.mrf.mxu0 }
 0x34a   :  { %v1135_v18 = vpop.f32.mrf.mxu0 }
 0x34c   :  { %v375_v19 = vpop.f32.mrf.mxu0 }
 0x34e   :  { %v1138_v20 = vpop.f32.mrf.mxu0 }
 0x34f   :  { %v1047_v20 = vld [vmem:[%s1540_s3 + $0x90] sm:$0xff] }
 0x350   :  { %v380_v21 = vpop.f32.mrf.mxu0 }
 0x351   :  { %1238 = vrcp.f32 %v380_v21 }
 0x352   :  { %v1141_v22 = vpop.f32.mrf.mxu0 }
 0x353   :  { %v1048_v22 = vld [vmem:[%s1540_s3 + $0x98] sm:$0xff] }
 0x35e   :  { %v1239_v23 = vpop.eup %1238 }
 0x35f   :  { %v388_v24 = vrot.slane %v1239_v23, %v1356_v9  ;;  %v1049_v23 = vld [vmem:[%s1540_s3 + $0xa0] sm:$0x1] }
 0x361   :  { %v389_v25 = vmul.f32 %v388_v24, %v370_v17  ;;  %v390_v26 = vmul.f32 %v388_v24, %v375_v19 }
 0x363   :  { %v393_v27 = vmul.f32 1.442695, %v390_v26  ;;  %v391_v28 = vmul.f32 1.442695, %v389_v25 }
 0x365   :  { %1240 = vpow2.f32 %v393_v27 }
 0x366   :  { %1242 = vpow2.f32 %v391_v28 }
 0x372   :  { %v1241_v29 = vpop.eup %1240 }
 0x373   :  { %1143 = vmatpush3.msra.mxu1 %v1241_v29  ;;  %v1243_v31 = vpop.eup %1242 }
 0x374   :  { %1144 = vmatprep.subr.mxu1 %v1302_v6 }
 0x375   :  { %1145 = vmatpush3.msra.mxu1 %v1243_v31 }
 0x376   :  { %1147 = vmatmul.mubr.msk.f32.vlgmr.msra.gmra.mxu1 %vm86_vm1, %v1029_v30  ;;  %1168 = vmatprep.subr.mxu1 %v1302_v6 }
 0x377   :  { %1149 = vmatprep.mubr.msk.f32.mxu1 %vm1303_vm0, %v1302_v6 }
 0x37a   :  { %1150 = vmatmul.mubr.msk.f32.gmra.mxu1 %vm86_vm1, %v1030_v32 }
 0x37b   :  { %1152 = vmatprep.mubr.msk.f32.mxu1 %vm1303_vm0, %v1302_v6 }
 0x37e   :  { %1153 = vmatmul.mubr.msk.f32.gmra.mxu1 %vm86_vm1, %v1031_v33 }
 0x37f   :  { %1172 = vmatprep.mubr.msk.f32.mxu1 %vm1303_vm0, %v1302_v6 }
 0x436   :  { %v474_v34 = vpop.f32.mrf.mxu1 }
 0x438   :  { %v1148_v35 = vpop.f32.mrf.mxu1 }
 0x43a   :  { %v479_v36 = vpop.f32.mrf.mxu1 }
 0x43c   :  { %v1151_v37 = vpop.f32.mrf.mxu1 }
 0x43d   :  { %v1053_v37 = vld [vmem:[%s1540_s3 + $0xa8] sm:$0xff] }
 0x43e   :  { %v484_v38 = vpop.f32.mrf.mxu1 }
 0x43f   :  { %1244 = vrcp.f32 %v484_v38 }
 0x440   :  { %v1154_v39 = vpop.f32.mrf.mxu1 }
 0x441   :  { %v1054_v39 = vld [vmem:[%s1540_s3 + $0xb0] sm:$0xff] }
 0x44c   :  { %v1245_v40 = vpop.eup %1244 }
 0x44d   :  { %v492_v41 = vrot.slane %v1245_v40, %v1356_v9  ;;  %v1055_v40 = vld [vmem:[%s1540_s3 + $0xb8] sm:$0x1] }
 0x44f   :  { %v493_v42 = vmul.f32 %v492_v41, %v474_v34  ;;  %v494_v43 = vmul.f32 %v492_v41, %v479_v36 }
 0x451   :  { %v497_v44 = vmul.f32 1.442695, %v494_v43  ;;  %v495_v45 = vmul.f32 1.442695, %v493_v42 }
 0x453   :  { %1246 = vpow2.f32 %v497_v44 }
 0x454   :  { %1248 = vpow2.f32 %v495_v45 }
 0x460   :  { %v1247_v46 = vpop.eup %1246 }
 0x461   :  { %1156 = vmatpush3.msra.mxu0 %v1247_v46  ;;  %v1249_v48 = vpop.eup %1248 }
 0x462   :  { %1157 = vmatprep.subr.mxu0 %v1302_v6 }
 0x463   :  { %1158 = vmatpush3.msra.mxu0 %v1249_v48 }
 0x464   :  { %1160 = vmatmul.mubr.msk.f32.vlgmr.msra.gmra.mxu0 %vm86_vm1, %v1035_v47  ;;  %1181 = vmatprep.subr.mxu0 %v1302_v6 }
 0x465   :  { %1162 = vmatprep.mubr.msk.f32.mxu0 %vm1303_vm0, %v1302_v6 }
 0x468   :  { %1163 = vmatmul.mubr.msk.f32.gmra.mxu0 %vm86_vm1, %v1036_v49 }
 0x469   :  { %1165 = vmatprep.mubr.msk.f32.mxu0 %vm1303_vm0, %v1302_v6 }
 0x46c   :  { %1166 = vmatmul.mubr.msk.f32.gmra.mxu0 %vm86_vm1, %v1037_v50 }
 0x46d   :  { %1185 = vmatprep.mubr.msk.f32.mxu0 %vm1303_vm0, %v1302_v6 }
 0x524   :  { %v578_v51 = vpop.f32.mrf.mxu0 }
 0x526   :  { %v1161_v52 = vpop.f32.mrf.mxu0 }
 0x528   :  { %v583_v53 = vpop.f32.mrf.mxu0 }
 0x52a   :  { %v1164_v54 = vpop.f32.mrf.mxu0 }
 0x52b   :  { %v915_v54 = vld [vmem:[%s1541_s4] sm:$0xf]  ;;  %s1278_s4 = scalar_lea.vmem %s1007_s22, 64 }
 0x52c   :  { %v588_v55 = vpop.f32.mrf.mxu0  ;;  %p1279_p0 = scmp.ne.s32.totalorder %s1007_s22, %s1278_s4  ;;  %p1284_p2 = scmp.lt.s32.totalorder %s1278_s4, %s1278_s4 }
 0x52d   :  { %1250 = vrcp.f32 %v588_v55 }
 0x52e   :  { %v1167_v56 = vpop.f32.mrf.mxu0  ;;  %p1285_p3 = por %p1284_p2, %p1283_p1 }
 0x530   :  { %p1286_p4 = pnand %p1285_p3, %p1279_p0 }
 0x53a   :  { %v1251_v57 = vpop.eup %1250 }
 0x53b   :  { %v596_v58 = vrot.slane %v1251_v57, %v1356_v9  ;;  %v992_v57 = vsub.s32 3, %v1353_v8 }
 0x53d   :  { %v597_v59 = vmul.f32 %v596_v58, %v578_v51  ;;  %v598_v60 = vmul.f32 %v596_v58, %v583_v53 }
 0x53f   :  { %v601_v61 = vmul.f32 1.442695, %v598_v60  ;;  %v599_v62 = vmul.f32 1.442695, %v597_v59 }
 0x541   :  { %1252 = vpow2.f32 %v601_v61 }
 0x542   :  { %1254 = vpow2.f32 %v599_v62 }
 0x54e   :  { %v1253_v63 = vpop.eup %1252 }
 0x54f   :  { %1169 = vmatpush3.msra.mxu1 %v1253_v63  ;;  %v1255_v1 = vpop.eup %1254 }
 0x550   :  { %1170 = vmatprep.subr.mxu1 %v1302_v6 }
 0x551   :  { %1171 = vmatpush3.msra.mxu1 %v1255_v1 }
 0x552   :  { %1173 = vmatmul.mubr.msk.f32.vlgmr.msra.gmra.mxu1 %vm86_vm1, %v1041_v0  ;;  %1194 = vmatprep.subr.mxu1 %v1302_v6 }
 0x553   :  { %1175 = vmatprep.mubr.msk.f32.mxu1 %vm1303_vm0, %v1302_v6 }
 0x556   :  { %1176 = vmatmul.mubr.msk.f32.gmra.mxu1 %vm86_vm1, %v1042_v2 }
 0x557   :  { %1178 = vmatprep.mubr.msk.f32.mxu1 %vm1303_vm0, %v1302_v6 }
 0x55a   :  { %1179 = vmatmul.mubr.msk.f32.gmra.mxu1 %vm86_vm1, %v1043_v3 }
 0x55b   :  { %1198 = vmatprep.mubr.msk.f32.mxu1 %vm1303_vm0, %v1302_v6 }
 0x612   :  { %v682_v4 = vpop.f32.mrf.mxu1 }
 0x614   :  { %v1174_v5 = vpop.f32.mrf.mxu1 }
 0x616   :  { %v687_v7 = vpop.f32.mrf.mxu1 }
 0x618   :  { %v1177_v10 = vpop.f32.mrf.mxu1 }
 0x61a   :  { %v692_v11 = vpop.f32.mrf.mxu1 }
 0x61b   :  { %1256 = vrcp.f32 %v692_v11 }
 0x61c   :  { %v1180_v12 = vpop.f32.mrf.mxu1 }
 0x628   :  { %v1257_v13 = vpop.eup %1256 }
 0x629   :  { %v700_v14 = vrot.slane %v1257_v13, %v1356_v9 }
 0x62b   :  { %v701_v15 = vmul.f32 %v700_v14, %v682_v4  ;;  %v702_v16 = vmul.f32 %v700_v14, %v687_v7 }
 0x62d   :  { %v705_v17 = vmul.f32 1.442695, %v702_v16  ;;  %v703_v18 = vmul.f32 1.442695, %v701_v15 }
 0x62f   :  { %1258 = vpow2.f32 %v705_v17 }
 0x630   :  { %1260 = vpow2.f32 %v703_v18 }
 0x63c   :  { %v1259_v19 = vpop.eup %1258 }
 0x63d   :  { %1182 = vmatpush3.msra.mxu0 %v1259_v19  ;;  %v1261_v21 = vpop.eup %1260 }
 0x63e   :  { %1183 = vmatprep.subr.mxu0 %v1302_v6 }
 0x63f   :  { %1184 = vmatpush3.msra.mxu0 %v1261_v21 }
 0x640   :  { %1186 = vmatmul.mubr.msk.f32.vlgmr.msra.gmra.mxu0 %vm86_vm1, %v1047_v20  ;;  %1207 = vmatprep.subr.mxu0 %v1302_v6 }
 0x641   :  { %1188 = vmatprep.mubr.msk.f32.mxu0 %vm1303_vm0, %v1302_v6 }
 0x644   :  { %1189 = vmatmul.mubr.msk.f32.gmra.mxu0 %vm86_vm1, %v1048_v22 }
 0x645   :  { %1191 = vmatprep.mubr.msk.f32.mxu0 %vm1303_vm0, %v1302_v6 }
 0x648   :  { %1192 = vmatmul.mubr.msk.f32.gmra.mxu0 %vm86_vm1, %v1049_v23 }
 0x649   :  { %1211 = vmatprep.mubr.msk.f32.mxu0 %vm1303_vm0, %v1302_v6 }
 0x700   :  { %v786_v24 = vpop.f32.mrf.mxu0 }
 0x702   :  { %v1187_v25 = vpop.f32.mrf.mxu0 }
 0x704   :  { %v791_v26 = vpop.f32.mrf.mxu0 }
 0x706   :  { %v1190_v27 = vpop.f32.mrf.mxu0 }
 0x708   :  { %v796_v28 = vpop.f32.mrf.mxu0 }
 0x709   :  { %1262 = vrcp.f32 %v796_v28 }
 0x70a   :  { %v1193_v29 = vpop.f32.mrf.mxu0 }
 0x716   :  { %v1263_v30 = vpop.eup %1262 }
 0x717   :  { %v804_v31 = vrot.slane %v1263_v30, %v1356_v9 }
 0x719   :  { %v805_v32 = vmul.f32 %v804_v31, %v786_v24  ;;  %v806_v33 = vmul.f32 %v804_v31, %v791_v26 }
 0x71b   :  { %v809_v34 = vmul.f32 1.442695, %v806_v33  ;;  %v807_v35 = vmul.f32 1.442695, %v805_v32 }
 0x71d   :  { %1264 = vpow2.f32 %v809_v34 }
 0x71e   :  { %1266 = vpow2.f32 %v807_v35 }
 0x72a   :  { %v1265_v36 = vpop.eup %1264 }
 0x72b   :  { %1195 = vmatpush3.msra.mxu1 %v1265_v36  ;;  %v1267_v38 = vpop.eup %1266 }
 0x72c   :  { %1196 = vmatprep.subr.mxu1 %v1302_v6 }
 0x72d   :  { %1197 = vmatpush3.msra.mxu1 %v1267_v38 }
 0x72e   :  { %1199 = vmatmul.mubr.msk.f32.vlgmr.msra.gmra.mxu1 %vm86_vm1, %v1053_v37 }
 0x72f   :  { %1201 = vmatprep.mubr.msk.f32.mxu1 %vm1303_vm0, %v1302_v6 }
 0x732   :  { %1202 = vmatmul.mubr.msk.f32.gmra.mxu1 %vm86_vm1, %v1054_v39 }
 0x733   :  { %1204 = vmatprep.mubr.msk.f32.mxu1 %vm1303_vm0, %v1302_v6 }
 0x736   :  { %1205 = vmatmul.mubr.msk.f32.gmra.mxu1 %vm86_vm1, %v1055_v40 }
 0x7ee   :  { %v890_v41 = vpop.f32.mrf.mxu1 }
 0x7f0   :  { %v1200_v42 = vpop.f32.mrf.mxu1 }
 0x7f2   :  { %v895_v43 = vpop.f32.mrf.mxu1 }
 0x7f4   :  { %v1203_v44 = vpop.f32.mrf.mxu1 }
 0x7f6   :  { %v900_v45 = vpop.f32.mrf.mxu1 }
 0x7f7   :  { %1268 = vrcp.f32 %v900_v45 }
 0x7f8   :  { %v1206_v46 = vpop.f32.mrf.mxu1 }
 0x804   :  { %v1269_v47 = vpop.eup %1268 }
 0x805   :  { %v908_v48 = vrot.slane %v1269_v47, %v1356_v9 }
 0x807   :  { %v909_v49 = vmul.f32 %v908_v48, %v890_v41  ;;  %v910_v50 = vmul.f32 %v908_v48, %v895_v43 }
 0x809   :  { %v913_v51 = vmul.f32 1.442695, %v910_v50  ;;  %v911_v52 = vmul.f32 1.442695, %v909_v49 }
 0x80b   :  { %1270 = vpow2.f32 %v913_v51 }
 0x80c   :  { %1272 = vpow2.f32 %v911_v52 }
 0x818   :  { %v1271_v53 = vpop.eup %1270 }
 0x819   :  { %1208 = vmatpush3.msra.mxu0 %v1271_v53  ;;  %v1273_v55 = vpop.eup %1272 }
 0x81a   :  { %1209 = vmatprep.subr.mxu0 %v1302_v6 }
 0x81b   :  { %1210 = vmatpush3.msra.mxu0 %v1273_v55 }
 0x81c   :  { %1212 = vmatmul.mubr.msk.f32.vlgmr.msra.gmra.mxu0 %vm86_vm1, %v915_v54 }
 0x8dc   :  { %v985_v56 = vpop.f32.mrf.mxu0 }
 0x8dd   :  { %1274 = vrcp.f32 %v985_v56 }
 0x8de   :  { %v1213_v9 = vpop.f32.mrf.mxu0 }
 0x8ea   :  { %v1275_v58 = vpop.eup %1274 }
 0x8eb   :  { %v993_v59 = vrot.slane %v1275_v58, %v992_v57 }
 0x8ed   :  { %v994_v60 = vmul.f32 %v993_v59, %v985_v56 }
 0x8ef   :  { %v995_v61 = vmul.f32 0.5, %v994_v60 }
 0x8f1   :  { %1276 = vtanh.f32 %v995_v61 }
 0x8fe   :  { %v1277_v62 = vpop.eup %1276 }
 0x8ff   :  { %v997_v63 = vmul.f32 0.5, %v1277_v62 }
 0x901   :  { %v998_v0 = vadd.f32 0.5, %v997_v63 }
 0x903   :  { %999 = vst [vmem:[#allocation2] sm:$0x7] %v998_v0 }
 0x904   :  { %1289 = shalt.err (!%p1286_p4)
}
 0x905   :  { %1009 = dma.vmem_to_hbm [thread:$0]  %s1007_s22, 64, %s1542_s5, [#allocation3]  }
 0x906   :  { %1298 = dma.done.wait [#allocation3], 64  }
 0x907   :  { %1299 = vsyncadd [#allocation3], 4294967232 }
 0x908   :  { %1013 = vsyncpa [#allocation3], 1 }

</bundles_post_ra>
